<compile_context>
chip_gen: v6e
topology: v6e:2x2x1
jax: 0.10.0
libtpu: 0.0.40
codegen_flags: <defaults>
</compile_context>

<pallas_src>
import jax
import jax.numpy as jnp
from jax import lax
from jax.experimental import pallas as pl
from jax.experimental.pallas import tpu as pltpu

_EPS = 1e-5


def _round_up(n, m):
    return ((n + m - 1) // m) * m


def _fusion_kernel(idx_ref, ta_ref, tb_ref, b1_ref, w2_ref, b2_ref,
                   w3_ref, b3_ref, o_ref):
    """Fused pair-gather + MLP. Layer-1 (and eval-mode BN) is pre-folded into
    the per-drug tables ta/tb, so the one-hot gather matmul lands directly in
    hidden-1 space."""
    tile = idx_ref.shape[0]
    ndp = ta_ref.shape[0]

    idx = idx_ref[...]                                   # [tile, 2] int32
    drug_a = idx[:, 0:1]                                 # [tile, 1]
    drug_b = idx[:, 1:2]
    lanes = lax.broadcasted_iota(jnp.int32, (tile, ndp), 1)
    onehot_a = (lanes == drug_a).astype(jnp.float32)     # [tile, ndp]
    onehot_b = (lanes == drug_b).astype(jnp.float32)

    # --- gather + layer 1 fused: one MXU pass per drug role (BN folded) ---
    h1 = (jnp.dot(onehot_a, ta_ref[...], preferred_element_type=jnp.float32)
          + jnp.dot(onehot_b, tb_ref[...], preferred_element_type=jnp.float32)
          + b1_ref[...])
    h1 = jnp.maximum(h1, 0.0)

    # --- layer 2: Linear + ReLU (eval-mode BN folded into w2/b2) ---
    h2 = jnp.dot(h1, w2_ref[...], preferred_element_type=jnp.float32) + b2_ref[...]
    h2 = jnp.maximum(h2, 0.0)

    # --- layer 3: Linear (output padded to 128 lanes; sliced in wrapper) ---
    out = jnp.dot(h2, w3_ref[...], preferred_element_type=jnp.float32) + b3_ref[...]
    o_ref[...] = out.astype(o_ref.dtype)


def xavier_uniform(key, fan_in, fan_out):
    bound = (6.0 / (fan_in + fan_out)) ** 0.5
    # stored [in, out]; xavier bound is symmetric in fan_in/fan_out
    return jax.random.uniform(key, (fan_in, fan_out), jnp.float32, -bound, bound)


def make_raw_params(key, embedding_num):
    """Mirrors PyTorch FusionLayer init: xavier Linear weights, zero biases,
    BatchNorm1d(weight=1, bias=0, running_mean=0, running_var=1)."""
    e = embedding_num
    d_in, h1, h2, d_out = 6 * e, 3 * e, 2 * e, 65
    k1, k2, k3 = jax.random.split(key, 3)
    w1 = xavier_uniform(k1, d_in, h1)
    w2 = xavier_uniform(k2, h1, h2)
    w3 = xavier_uniform(k3, h2, d_out)
    z, o = jnp.zeros, jnp.ones
    return (w1, z((h1,)), o((h1,)), z((h1,)), z((h1,)), o((h1,)),
            w2, z((h2,)), o((h2,)), z((h2,)), z((h2,)), o((h2,)),
            w3, z((d_out,)))


def fold_and_pad_params(raw):
    """Fold eval-mode BatchNorm into the Linear weights and zero-pad all
    feature dims to multiples of 128 (lane-dense layout). Layer-1 weights are
    kept split per drug half with an unpadded input dim so they can be folded
    into the drug table in the wrapper."""
    (w1, b1, g1, beta1, mu1, var1,
     w2, b2, g2, beta2, mu2, var2,
     w3, b3) = raw

    s1 = g1 / jnp.sqrt(var1 + _EPS)     # > 0 required for the ReLU fold
    t1 = beta1 - mu1 * s1
    s2 = g2 / jnp.sqrt(var2 + _EPS)
    t2 = beta2 - mu2 * s2

    # relu(z) * s == relu(z * s) for s > 0; the BN shift folds into the
    # next layer's bias (t @ W_next).
    w1f = w1 * s1[None, :]
    b1f = b1 * s1
    w2f = w2 * s2[None, :]
    b2f = (b2 + t1 @ w2) * s2
    w3f = w3
    b3f = b3 + t2 @ w3

    d_in, h1 = w1f.shape
    h2 = w2f.shape[1]
    d_out = w3f.shape[1]
    t3 = d_in // 2                      # per-drug concat width = 3E

    h1p = _round_up(h1, 128)
    h2p = _round_up(h2, 128)
    dop = _round_up(d_out, 128)

    def pad2(a, rows, cols):
        return jnp.pad(a, ((0, rows - a.shape[0]), (0, cols - a.shape[1])))

    w1a = pad2(w1f[:t3, :], t3, h1p)    # [3E, h1p] — drug-A half of layer 1
    w1b = pad2(w1f[t3:, :], t3, h1p)    # [3E, h1p] — drug-B half
    b1p = pad2(b1f[None, :], 1, h1p)
    w2p = pad2(w2f, h1p, h2p)
    b2p = pad2(b2f[None, :], 1, h2p)
    w3p = pad2(w3f, h2p, dop)
    b3p = pad2(b3f[None, :], 1, dop)
    return (w1a, w1b, b1p, w2p, b2p, w3p, b3p), d_out


def fusion_layer_forward(gnn3, gnn2, gnn1, idx, kernel_params, d_out,
                         *, batch_tile=1024):
    """Mirrors FusionLayer.forward (eval mode). idx: [B, 2] int32."""
    w1a, w1b, b1, w2, b2, w3, b3 = kernel_params
    h1p, h2p, dop = w1a.shape[1], w2.shape[1], w3.shape[1]

    # Concatenated per-drug table [num_drugs, 3E].
    table = jnp.concatenate([gnn1, gnn2, gnn3], axis=1).astype(jnp.float32)
    n_drugs = table.shape[0]
    ndp = _round_up(n_drugs, 128)

    # Batch-independent strength reduction (NOT a per-element wrapper mul):
    # project the drug table through the BN-folded layer-1 weights once, so
    # the per-row gather lands directly in hidden-1 space and the [B, 6E]
    # embedding / per-row layer-1 matmul never exist.
    ta = jnp.pad(table @ w1a, ((0, ndp - n_drugs), (0, 0)))   # [ndp, h1p]
    tb = jnp.pad(table @ w1b, ((0, ndp - n_drugs), (0, 0)))   # [ndp, h1p]

    idx = idx.astype(jnp.int32)
    b = idx.shape[0]
    tile_b = min(batch_tile, _round_up(b, 8))    # multiple of 8, capped by B
    bp = _round_up(b, tile_b)
    idx_p = jnp.pad(idx, ((0, bp - b), (0, 0)))  # padded rows gather drug 0

    grid = (bp // tile_b,)
    full = lambda shape: pl.BlockSpec(shape, lambda i: (0, 0))

    flops = 2 * bp * (2 * ndp * h1p + h1p * h2p + h2p * dop)
    bytes_accessed = 4 * (bp * 2 + bp * dop + 2 * ndp * h1p
                          + h1p * h2p + h2p * dop + h1p + h2p + dop)

    out = pl.pallas_call(
        _fusion_kernel,
        out_shape=jax.ShapeDtypeStruct((bp, dop), jnp.float32),
        grid_spec=pltpu.PrefetchScalarGridSpec(
            num_scalar_prefetch=0,
            grid=grid,
            in_specs=[
                pl.BlockSpec((tile_b, 2), lambda i: (i, 0)),   # idx (batch-tiled)
                full((ndp, h1p)),                              # drug-A hidden table
                full((ndp, h1p)),                              # drug-B hidden table
                full((1, h1p)),
                full((h1p, h2p)), full((1, h2p)),
                full((h2p, dop)), full((1, dop)),
            ],
            out_specs=pl.BlockSpec((tile_b, dop), lambda i: (i, 0)),
        ),
        compiler_params=pltpu.CompilerParams(
            dimension_semantics=("parallel",)),
        cost_estimate=pl.CostEstimate(
            flops=int(flops), transcendentals=0,
            bytes_accessed=int(bytes_accessed)),
    )(idx_p, ta, tb, b1, w2, b2, w3, b3)

    return out[:b, :d_out]


def _reference(gnn3, gnn2, gnn1, idx, raw):
    (w1, b1, g1, beta1, mu1, var1,
     w2, b2, g2, beta2, mu2, var2,
     w3, b3) = raw
    drug_a, drug_b = idx[:, 0], idx[:, 1]
    x = jnp.concatenate(
        [gnn1[drug_a], gnn2[drug_a], gnn3[drug_a],
         gnn1[drug_b], gnn2[drug_b], gnn3[drug_b]], axis=1).astype(jnp.float32)

    def bn(a, g, beta, mu, var):
        return (a - mu) / jnp.sqrt(var + _EPS) * g + beta

    h1 = bn(jnp.maximum(x @ w1 + b1, 0.0), g1, beta1, mu1, var1)
    h2 = bn(jnp.maximum(h1 @ w2 + b2, 0.0), g2, beta2, mu2, var2)
    return h2 @ w3 + b3


if __name__ == "__main__":
    embedding_num = 32        # layer dims: 192 -> 96 -> 64 -> 65
    num_drugs = 10
    batch = 8

    key = jax.random.PRNGKey(0)
    kp, k3, k2, k1, ki = jax.random.split(key, 5)

    raw = make_raw_params(kp, embedding_num)
    kernel_params, d_out = fold_and_pad_params(raw)

    gnn3 = jax.random.normal(k3, (num_drugs, embedding_num), jnp.float32)
    gnn2 = jax.random.normal(k2, (num_drugs, embedding_num), jnp.float32)
    gnn1 = jax.random.normal(k1, (num_drugs, embedding_num), jnp.float32)
    idx = jax.random.randint(ki, (batch, 2), 0, num_drugs, jnp.int32)

    out = jax.block_until_ready(
        fusion_layer_forward(gnn3, gnn2, gnn1, idx, kernel_params, d_out))
    ref = jax.block_until_ready(_reference(gnn3, gnn2, gnn1, idx, raw))

    assert out.shape == (batch, 65), out.shape
    assert jnp.allclose(out, ref, atol=1e-4, rtol=1e-4), \
        float(jnp.max(jnp.abs(out - ref)))
    print("KERNEL_OK")
</pallas_src>

<mosaic_0001>
module attributes {stable_mosaic.version = 11 : i64} {
  func.func @_fusion_kernel(%arg0: i32, %arg1: memref<8x2xi32, #tpu.memory_space<vmem>>, %arg2: memref<128x128xf32, #tpu.memory_space<vmem>>, %arg3: memref<128x128xf32, #tpu.memory_space<vmem>>, %arg4: memref<1x128xf32, #tpu.memory_space<vmem>>, %arg5: memref<128x128xf32, #tpu.memory_space<vmem>>, %arg6: memref<1x128xf32, #tpu.memory_space<vmem>>, %arg7: memref<128x128xf32, #tpu.memory_space<vmem>>, %arg8: memref<1x128xf32, #tpu.memory_space<vmem>>, %arg9: memref<8x128xf32, #tpu.memory_space<vmem>>) attributes {dimension_semantics = [#tpu.dimension_semantics<parallel>], iteration_bounds = array<i64: 1>, scalar_prefetch = 0 : i64, scratch_operands = 0 : i64, tpu.core_type = #tpu.core_type<tc>, window_params = [{transform_indices = @transform_0, window_bounds = array<i64: 8, 2>}, {pipeline_mode = #tpu.pipeline_mode<synchronous>, transform_indices = @transform_1, window_bounds = array<i64: 128, 128>}, {pipeline_mode = #tpu.pipeline_mode<synchronous>, transform_indices = @transform_2, window_bounds = array<i64: 128, 128>}, {pipeline_mode = #tpu.pipeline_mode<synchronous>, transform_indices = @transform_3, window_bounds = array<i64: 1, 128>}, {pipeline_mode = #tpu.pipeline_mode<synchronous>, transform_indices = @transform_4, window_bounds = array<i64: 128, 128>}, {pipeline_mode = #tpu.pipeline_mode<synchronous>, transform_indices = @transform_5, window_bounds = array<i64: 1, 128>}, {pipeline_mode = #tpu.pipeline_mode<synchronous>, transform_indices = @transform_6, window_bounds = array<i64: 128, 128>}, {pipeline_mode = #tpu.pipeline_mode<synchronous>, transform_indices = @transform_7, window_bounds = array<i64: 1, 128>}, {transform_indices = @transform_8, window_bounds = array<i64: 8, 128>}]} {
    %c0 = arith.constant 0 : index
    %c0_0 = arith.constant 0 : index
    %0 = vector.load %arg1[%c0, %c0_0] : memref<8x2xi32, #tpu.memory_space<vmem>>, vector<8x2xi32>
    %1 = vector.extract_strided_slice %0 {offsets = [0, 0], sizes = [8, 1], strides = [1, 1]} : vector<8x2xi32> to vector<8x1xi32>
    %2 = vector.extract_strided_slice %0 {offsets = [0, 1], sizes = [8, 1], strides = [1, 1]} : vector<8x2xi32> to vector<8x1xi32>
    %3 = tpu.iota {dimensions = array<i32: 1>} : vector<8x128xi32>
    %4 = vector.broadcast %1 : vector<8x1xi32> to vector<8x128xi32>
    %5 = arith.cmpi eq, %3, %4 : vector<8x128xi32>
    %6 = arith.extui %5 : vector<8x128xi1> to vector<8x128xi32>
    %7 = arith.sitofp %6 : vector<8x128xi32> to vector<8x128xf32>
    %8 = vector.broadcast %2 : vector<8x1xi32> to vector<8x128xi32>
    %9 = arith.cmpi eq, %3, %8 : vector<8x128xi32>
    %10 = arith.extui %9 : vector<8x128xi1> to vector<8x128xi32>
    %11 = arith.sitofp %10 : vector<8x128xi32> to vector<8x128xf32>
    %c0_1 = arith.constant 0 : index
    %c0_2 = arith.constant 0 : index
    %12 = vector.load %arg2[%c0_1, %c0_2] : memref<128x128xf32, #tpu.memory_space<vmem>>, vector<128x128xf32>
    %cst = arith.constant dense<0.000000e+00> : vector<8x128xf32>
    %13 = tpu.matmul %7, %12, %cst {dimension_numbers = #tpu.dot_dimension_numbers<[1], [0], [0], [1], [0, 0, 1, 1], [], []>} : vector<8x128xf32>, vector<128x128xf32>, vector<8x128xf32> -> vector<8x128xf32>
    %c0_3 = arith.constant 0 : index
    %c0_4 = arith.constant 0 : index
    %14 = vector.load %arg3[%c0_3, %c0_4] : memref<128x128xf32, #tpu.memory_space<vmem>>, vector<128x128xf32>
    %cst_5 = arith.constant dense<0.000000e+00> : vector<8x128xf32>
    %15 = tpu.matmul %11, %14, %cst_5 {dimension_numbers = #tpu.dot_dimension_numbers<[1], [0], [0], [1], [0, 0, 1, 1], [], []>} : vector<8x128xf32>, vector<128x128xf32>, vector<8x128xf32> -> vector<8x128xf32>
    %16 = arith.addf %13, %15 : vector<8x128xf32>
    %c0_6 = arith.constant 0 : index
    %c0_7 = arith.constant 0 : index
    %17 = vector.load %arg4[%c0_6, %c0_7] : memref<1x128xf32, #tpu.memory_space<vmem>>, vector<1x128xf32>
    %18 = vector.broadcast %17 : vector<1x128xf32> to vector<8x128xf32>
    %19 = arith.addf %16, %18 : vector<8x128xf32>
    %cst_8 = arith.constant 0.000000e+00 : f32
    %20 = vector.broadcast %cst_8 : f32 to vector<8x128xf32>
    %21 = arith.maximumf %19, %20 : vector<8x128xf32>
    %c0_9 = arith.constant 0 : index
    %c0_10 = arith.constant 0 : index
    %22 = vector.load %arg5[%c0_9, %c0_10] : memref<128x128xf32, #tpu.memory_space<vmem>>, vector<128x128xf32>
    %cst_11 = arith.constant dense<0.000000e+00> : vector<8x128xf32>
    %23 = tpu.matmul %21, %22, %cst_11 {dimension_numbers = #tpu.dot_dimension_numbers<[1], [0], [0], [1], [0, 0, 1, 1], [], []>} : vector<8x128xf32>, vector<128x128xf32>, vector<8x128xf32> -> vector<8x128xf32>
    %c0_12 = arith.constant 0 : index
    %c0_13 = arith.constant 0 : index
    %24 = vector.load %arg6[%c0_12, %c0_13] : memref<1x128xf32, #tpu.memory_space<vmem>>, vector<1x128xf32>
    %25 = vector.broadcast %24 : vector<1x128xf32> to vector<8x128xf32>
    %26 = arith.addf %23, %25 : vector<8x128xf32>
    %cst_14 = arith.constant 0.000000e+00 : f32
    %27 = vector.broadcast %cst_14 : f32 to vector<8x128xf32>
    %28 = arith.maximumf %26, %27 : vector<8x128xf32>
    %c0_15 = arith.constant 0 : index
    %c0_16 = arith.constant 0 : index
    %29 = vector.load %arg7[%c0_15, %c0_16] : memref<128x128xf32, #tpu.memory_space<vmem>>, vector<128x128xf32>
    %cst_17 = arith.constant dense<0.000000e+00> : vector<8x128xf32>
    %30 = tpu.matmul %28, %29, %cst_17 {dimension_numbers = #tpu.dot_dimension_numbers<[1], [0], [0], [1], [0, 0, 1, 1], [], []>} : vector<8x128xf32>, vector<128x128xf32>, vector<8x128xf32> -> vector<8x128xf32>
    %c0_18 = arith.constant 0 : index
    %c0_19 = arith.constant 0 : index
    %31 = vector.load %arg8[%c0_18, %c0_19] : memref<1x128xf32, #tpu.memory_space<vmem>>, vector<1x128xf32>
    %32 = vector.broadcast %31 : vector<1x128xf32> to vector<8x128xf32>
    %33 = arith.addf %30, %32 : vector<8x128xf32>
    %c0_20 = arith.constant 0 : index
    %c0_21 = arith.constant 0 : index
    %34 = vector.load %arg9[%c0_20, %c0_21] : memref<8x128xf32, #tpu.memory_space<vmem>>, vector<8x128xf32>
    tpu.vector_store %arg9[%c0_20, %c0_21], %33 {strides = array<i32>} : memref<8x128xf32, #tpu.memory_space<vmem>>, vector<8x128xf32>,
    return
  }
  func.func @transform_0(%arg0: i32) -> (i32, i32) {
    %c0_i32 = arith.constant 0 : i32
    %c0_i32_0 = arith.constant 0 : i32
    return %arg0, %c0_i32 : i32, i32
  }
  func.func @transform_1(%arg0: i32) -> (i32, i32) {
    %c0_i32 = arith.constant 0 : i32
    %c0_i32_0 = arith.constant 0 : i32
    %c0_i32_1 = arith.constant 0 : i32
    return %c0_i32, %c0_i32_0 : i32, i32
  }
  func.func @transform_2(%arg0: i32) -> (i32, i32) {
    %c0_i32 = arith.constant 0 : i32
    %c0_i32_0 = arith.constant 0 : i32
    %c0_i32_1 = arith.constant 0 : i32
    return %c0_i32, %c0_i32_0 : i32, i32
  }
  func.func @transform_3(%arg0: i32) -> (i32, i32) {
    %c0_i32 = arith.constant 0 : i32
    %c0_i32_0 = arith.constant 0 : i32
    %c0_i32_1 = arith.constant 0 : i32
    return %c0_i32, %c0_i32_0 : i32, i32
  }
  func.func @transform_4(%arg0: i32) -> (i32, i32) {
    %c0_i32 = arith.constant 0 : i32
    %c0_i32_0 = arith.constant 0 : i32
    %c0_i32_1 = arith.constant 0 : i32
    return %c0_i32, %c0_i32_0 : i32, i32
  }
  func.func @transform_5(%arg0: i32) -> (i32, i32) {
    %c0_i32 = arith.constant 0 : i32
    %c0_i32_0 = arith.constant 0 : i32
    %c0_i32_1 = arith.constant 0 : i32
    return %c0_i32, %c0_i32_0 : i32, i32
  }
  func.func @transform_6(%arg0: i32) -> (i32, i32) {
    %c0_i32 = arith.constant 0 : i32
    %c0_i32_0 = arith.constant 0 : i32
    %c0_i32_1 = arith.constant 0 : i32
    return %c0_i32, %c0_i32_0 : i32, i32
  }
  func.func @transform_7(%arg0: i32) -> (i32, i32) {
    %c0_i32 = arith.constant 0 : i32
    %c0_i32_0 = arith.constant 0 : i32
    %c0_i32_1 = arith.constant 0 : i32
    return %c0_i32, %c0_i32_0 : i32, i32
  }
  func.func @transform_8(%arg0: i32) -> (i32, i32) {
    %c0_i32 = arith.constant 0 : i32
    %c0_i32_0 = arith.constant 0 : i32
    return %arg0, %c0_i32 : i32, i32
  }
}

</mosaic_0001>

<bundles_post_ra>
// kernel: tpu_custom_call.1
= control target key start
LH: loop header
LB: loop body
LE: loop exit
PB: predicated region body
PF: predicated region fallthrough
CT: control target
= control target key end

     0   :  { %13 = vsyncpa [#allocation3], 0  ;;  %s991_s0 = inlined_call_operand.vmem [shape: s32[8,2], index: 0, kind: input, shape index: {}]   ;;  %s992_s1 = inlined_call_operand.hbm [shape: f32[128,128], index: 1, kind: input, shape index: {}]   ;;  %s993_s2 = inlined_call_operand.hbm [shape: f32[128,128], index: 2, kind: input, shape index: {}]   ;;  %s994_s3 = inlined_call_operand.vmem [shape: f32[1,128], index: 3, kind: input, shape index: {}]   ;;  %s995_s4 = inlined_call_operand.hbm [shape: f32[128,128], index: 4, kind: input, shape index: {}]   ;;  %s996_s5 = inlined_call_operand.vmem [shape: f32[1,128], index: 5, kind: input, shape index: {}]   ;;  %s997_s6 = inlined_call_operand.hbm [shape: f32[128,128], index: 6, kind: input, shape index: {}]   ;;  %s998_s7 = inlined_call_operand.vmem [shape: f32[1,128], index: 7, kind: input, shape index: {}]   ;;  %s999_s8 = inlined_call_operand.hbm [shape: f32[8,128], index: 8, kind: output, shape index: {}]  }
   0x1   :  { %14 = vsyncpa [#allocation6], 0 }
   0x2   :  { %15 = vsyncpa [#allocation9], 0 }
   0x3   :  { %16 = vsyncpa [#allocation4], 0  ;;  %s823_s27 = smov [#allocation5]   ;;  %s824_s29 = smov [#allocation2]  }
   0x4   :  { %s36_s28 = sshll.u32 %s823_s27, 4  ;;  %s24_s30 = sshll.u32 %s824_s29, 4  ;;  %s37_s28 = int_to_ptr.vmem [resolvable:$true] %s36_s28  ;;  %s25_s30 = int_to_ptr.vmem [resolvable:$true] %s24_s30 }
   0x5   :  { %s723_s9 = scalar_lea.vmem %s37_s28, 2048  ;;  %p728_p1 = scmp.lt.s32.totalorder %s37_s28, %s37_s28 }
   0x6   :  { %p724_p0 = scmp.ne.s32.totalorder %s37_s28, %s723_s9  ;;  %p729_p2 = scmp.lt.s32.totalorder %s723_s9, %s723_s9 }
   0x8   :  { %p730_p3 = por %p729_p2, %p728_p1 }
   0xa   :  { %p731_p4 = pnand %p730_p3, %p724_p0 }
   0xc   :  { %734 = shalt.err (!%p731_p4)
}
   0xd   :  { %s825_s10 = smov 128   ;;  %s826_s11 = smov 8  }
   0xe   :  { %42 = dma.hbm_to_vmem [thread:$0]  %s993_s2, 2048, %s37_s28, [#allocation6], %s825_s10, %s825_s10, %s826_s11  }
   0xf   :  { %s743_s14 = scalar_lea.vmem %s25_s30, 2048  ;;  %p748_p6 = scmp.lt.s32.totalorder %s25_s30, %s25_s30 }
  0x10   :  { %p744_p5 = scmp.ne.s32.totalorder %s25_s30, %s743_s14  ;;  %p749_p7 = scmp.lt.s32.totalorder %s743_s14, %s743_s14 }
  0x12   :  { %p750_p8 = por %p749_p7, %p748_p6 }
  0x14   :  { %p751_p9 = pnand %p750_p8, %p744_p5 }
  0x16   :  { %754 = shalt.err (!%p751_p9)
}
  0x17   :  { %30 = dma.hbm_to_vmem [thread:$0]  %s992_s1, 2048, %s25_s30, [#allocation3], %s825_s10, %s825_s10, %s826_s11  }
  0x18   :  { %s827_s17 = smov [#allocation7]   ;;  %s828_s19 = smov [#allocation8]  }
  0x19   :  { %s50_s18 = sshll.u32 %s827_s17, 4  ;;  %s64_s20 = sshll.u32 %s828_s19, 4  ;;  %s51_s18 = int_to_ptr.vmem [resolvable:$true] %s50_s18  ;;  %s65_s20 = int_to_ptr.vmem [resolvable:$true] %s64_s20 }
  0x1a   :  { %s763_s2 = scalar_lea.vmem %s51_s18, 2048  ;;  %p768_p11 = scmp.lt.s32.totalorder %s51_s18, %s51_s18 }
  0x1b   :  { %p764_p10 = scmp.ne.s32.totalorder %s51_s18, %s763_s2  ;;  %p769_p12 = scmp.lt.s32.totalorder %s763_s2, %s763_s2 }
  0x1d   :  { %p770_p13 = por %p769_p12, %p768_p11 }
  0x1f   :  { %p771_p0 = pnand %p770_p13, %p764_p10 }
  0x21   :  { %774 = shalt.err (!%p771_p0)
}
  0x22   :  { %56 = dma.hbm_to_vmem [thread:$0]  %s995_s4, 2048, %s51_s18, [#allocation6], %s825_s10, %s825_s10, %s826_s11  }
  0x23   :  { %s783_s1 = scalar_lea.vmem %s65_s20, 2048  ;;  %p788_p2 = scmp.lt.s32.totalorder %s65_s20, %s65_s20 }
  0x24   :  { %p784_p1 = scmp.ne.s32.totalorder %s65_s20, %s783_s1  ;;  %p789_p3 = scmp.lt.s32.totalorder %s783_s1, %s783_s1 }
  0x26   :  { %p790_p4 = por %p789_p3, %p788_p2 }
  0x28   :  { %p791_p5 = pnand %p790_p4, %p784_p1 }
  0x2a   :  { %794 = shalt.err (!%p791_p5)
}
  0x2b   :  { %70 = dma.hbm_to_vmem [thread:$0]  %s997_s6, 2048, %s65_s20, [#allocation9], %s825_s10, %s825_s10, %s826_s11  }
  0x2c   :  { %815 = dma.done.wait [#allocation3], 2048  }
  0x2d   :  { %816 = vsyncadd [#allocation3], 4294965248 }
  0x2e   :  { %817 = dma.done.wait [#allocation6], 4096  }
  0x2f   :  { %818 = vsyncadd [#allocation6], 4294963200 }
  0x30   :  { %819 = dma.done.wait [#allocation9], 2048  }
  0x31   :  { %820 = vsyncadd [#allocation9], 4294965248  ;;  %v829_v0 = vmov 0   ;;  %v830_v1 = vmov 0.0   ;;  %vm831_vm0 = vmmov 0   ;;  %v85_v2 = vld [vmem:[%s991_s0] sm:$0xff]  ;;  %v86_v36 = vlaneseq }
  0x32   :  { %713 = vset.pattern.permute.xlu0 %v829_v0  ;;  %596 = vmatprep.subr.mxu1 %v830_v1  ;;  %v115_v3 = vld [vmem:[#allocation2 + $0x78] sm:$0xff]  ;;  %v114_v4 = vld [vmem:[#allocation2 + $0x70] sm:$0xff]  ;;  %v113_v6 = vld [vmem:[#allocation2 + $0x68] sm:$0xff]  ;;  %v832_v9 = vmov 1   ;;  %v833_v39 = vmov 1.0   ;;  %s834_s29 = smov [#allocation10]  }
  0x33   :  { %561 = vmatprep.subr.mxu0 %v830_v1  ;;  %628 = vmatprep.mubr.msk.f32.mxu1 %vm831_vm0, %v830_v1  ;;  %v131_v5 = vld [vmem:[#allocation5 + $0x78] sm:$0xff]  ;;  %v130_v7 = vld [vmem:[#allocation5 + $0x70] sm:$0xff]  ;;  %v112_v8 = vld [vmem:[#allocation2 + $0x60] sm:$0xff]  ;;  %v87_v37 = vand.u32 127, %v86_v36  ;;  %s475_s30 = sshll.u32 %s834_s29, 4  ;;  %s476_s30 = int_to_ptr.vmem [resolvable:$true] %s475_s30 }
  0x34   :  { %593 = vmatprep.mubr.msk.f32.mxu0 %vm831_vm0, %v830_v1  ;;  %89 = vperm.xlu0 %713, %v85_v2   ;;  %v129_v10 = vld [vmem:[#allocation5 + $0x68] sm:$0xff]  ;;  %v111_v11 = vld [vmem:[#allocation2 + $0x58] sm:$0xff]  ;;  %v128_v12 = vld [vmem:[#allocation5 + $0x60] sm:$0xff]  ;;  %s795_s9 = scalar_lea.vmem %s476_s30, 128  ;;  %p800_p7 = scmp.lt.s32.totalorder %s476_s30, %s476_s30 }
  0x35   :  { %597 = vmatpush3.msra.mxu1 %v115_v3  ;;  %562 = vmatpush3.msra.mxu0 %v131_v5  ;;  %v110_v13 = vld [vmem:[#allocation2 + $0x50] sm:$0xff]  ;;  %v127_v14 = vld [vmem:[#allocation5 + $0x58] sm:$0xff]  ;;  %v109_v15 = vld [vmem:[#allocation2 + $0x48] sm:$0xff]  ;;  %p796_p6 = scmp.ne.s32.totalorder %s476_s30, %s795_s9  ;;  %p801_p8 = scmp.lt.s32.totalorder %s795_s9, %s795_s9 }
  0x36   :  { %598 = vmatprep.subr.mxu1 %v830_v1  ;;  %563 = vmatprep.subr.mxu0 %v830_v1  ;;  %v126_v16 = vld [vmem:[#allocation5 + $0x50] sm:$0xff]  ;;  %v108_v17 = vld [vmem:[#allocation2 + $0x40] sm:$0xff]  ;;  %v125_v18 = vld [vmem:[#allocation5 + $0x48] sm:$0xff] }
  0x37   :  { %599 = vmatpush3.msra.mxu1 %v114_v4  ;;  %564 = vmatpush3.msra.mxu0 %v130_v7  ;;  %v107_v19 = vld [vmem:[#allocation2 + $0x38] sm:$0xff]  ;;  %v124_v20 = vld [vmem:[#allocation5 + $0x40] sm:$0xff]  ;;  %v106_v21 = vld [vmem:[#allocation2 + $0x30] sm:$0xff]  ;;  %p802_p9 = por %p801_p8, %p800_p7 }
  0x38   :  { %600 = vmatprep.subr.mxu1 %v830_v1  ;;  %714 = vset.pattern.permute.xlu0 %v832_v9  ;;  %v123_v22 = vld [vmem:[#allocation5 + $0x38] sm:$0xff]  ;;  %v105_v23 = vld [vmem:[#allocation2 + $0x28] sm:$0xff]  ;;  %v122_v24 = vld [vmem:[#allocation5 + $0x30] sm:$0xff] }
  0x39   :  { %601 = vmatpush3.msra.mxu1 %v113_v6  ;;  %95 = vperm.xlu0 %714, %v85_v2   ;;  %v104_v25 = vld [vmem:[#allocation2 + $0x20] sm:$0xff]  ;;  %v121_v26 = vld [vmem:[#allocation5 + $0x28] sm:$0xff]  ;;  %v103_v27 = vld [vmem:[#allocation2 + $0x18] sm:$0xff]  ;;  %p803_p10 = pnand %p802_p9, %p796_p6 }
  0x3a   :  { %602 = vmatprep.subr.mxu1 %v830_v1  ;;  %565 = vmatprep.subr.mxu0 %v830_v1  ;;  %v120_v28 = vld [vmem:[#allocation5 + $0x20] sm:$0xff]  ;;  %v102_v29 = vld [vmem:[#allocation2 + $0x10] sm:$0xff]  ;;  %v119_v30 = vld [vmem:[#allocation5 + $0x18] sm:$0xff] }
  0x3b   :  { %603 = vmatpush3.msra.mxu1 %v112_v8  ;;  %566 = vmatpush3.msra.mxu0 %v129_v10  ;;  %v101_v31 = vld [vmem:[#allocation2 + $0x8] sm:$0xff]  ;;  %v118_v32 = vld [vmem:[#allocation5 + $0x10] sm:$0xff]  ;;  %v100_v33 = vld [vmem:[#allocation2] sm:$0xff] }
  0x3c   :  { %604 = vmatprep.subr.mxu1 %v830_v1  ;;  %567 = vmatprep.subr.mxu0 %v830_v1  ;;  %v117_v34 = vld [vmem:[#allocation5 + $0x8] sm:$0xff]  ;;  %v116_v35 = vld [vmem:[#allocation5] sm:$0xff]  ;;  %v296_v41 = vld [vmem:[#allocation7 + $0x78] sm:$0xff] }
  0x3d   :  { %605 = vmatpush3.msra.mxu1 %v111_v11  ;;  %568 = vmatpush3.msra.mxu0 %v128_v12  ;;  %v295_v42 = vld [vmem:[#allocation7 + $0x70] sm:$0xff]  ;;  %v294_v43 = vld [vmem:[#allocation7 + $0x68] sm:$0xff]  ;;  %v293_v44 = vld [vmem:[#allocation7 + $0x60] sm:$0xff] }
  0x3e   :  { %606 = vmatprep.subr.mxu1 %v830_v1  ;;  %569 = vmatprep.subr.mxu0 %v830_v1  ;;  %v292_v45 = vld [vmem:[#allocation7 + $0x58] sm:$0xff]  ;;  %v291_v46 = vld [vmem:[#allocation7 + $0x50] sm:$0xff]  ;;  %v290_v47 = vld [vmem:[#allocation7 + $0x48] sm:$0xff] }
  0x3f   :  { %607 = vmatpush3.msra.mxu1 %v110_v13  ;;  %570 = vmatpush3.msra.mxu0 %v127_v14  ;;  %v289_v48 = vld [vmem:[#allocation7 + $0x40] sm:$0xff]  ;;  %v288_v49 = vld [vmem:[#allocation7 + $0x38] sm:$0xff]  ;;  %v287_v50 = vld [vmem:[#allocation7 + $0x30] sm:$0xff] }
  0x40   :  { %608 = vmatprep.subr.mxu1 %v830_v1  ;;  %571 = vmatprep.subr.mxu0 %v830_v1  ;;  %v286_v51 = vld [vmem:[#allocation7 + $0x28] sm:$0xff]  ;;  %v285_v52 = vld [vmem:[#allocation7 + $0x20] sm:$0xff]  ;;  %v284_v53 = vld [vmem:[#allocation7 + $0x18] sm:$0xff] }
  0x41   :  { %609 = vmatpush3.msra.mxu1 %v109_v15  ;;  %572 = vmatpush3.msra.mxu0 %v126_v16  ;;  %v283_v54 = vld [vmem:[#allocation7 + $0x10] sm:$0xff]  ;;  %v282_v55 = vld [vmem:[#allocation7 + $0x8] sm:$0xff]  ;;  %v281_v56 = vld [vmem:[#allocation7] sm:$0xff] }
  0x42   :  { %610 = vmatprep.subr.mxu1 %v830_v1  ;;  %573 = vmatprep.subr.mxu0 %v830_v1  ;;  %v390_v57 = vld [vmem:[#allocation8 + $0x78] sm:$0xff]  ;;  %v389_v58 = vld [vmem:[#allocation8 + $0x70] sm:$0xff]  ;;  %v388_v59 = vld [vmem:[#allocation8 + $0x68] sm:$0xff] }
  0x43   :  { %611 = vmatpush3.msra.mxu1 %v108_v17  ;;  %574 = vmatpush3.msra.mxu0 %v125_v18  ;;  %v387_v60 = vld [vmem:[#allocation8 + $0x60] sm:$0xff]  ;;  %v386_v61 = vld [vmem:[#allocation8 + $0x58] sm:$0xff]  ;;  %v385_v62 = vld [vmem:[#allocation8 + $0x50] sm:$0xff] }
  0x44   :  { %612 = vmatprep.subr.mxu1 %v830_v1  ;;  %575 = vmatprep.subr.mxu0 %v830_v1  ;;  %v384_v63 = vld [vmem:[#allocation8 + $0x48] sm:$0xff]  ;;  %v383_v0 = vld [vmem:[#allocation8 + $0x40] sm:$0xff]  ;;  %v382_v2 = vld [vmem:[#allocation8 + $0x38] sm:$0xff] }
  0x45   :  { %613 = vmatpush3.msra.mxu1 %v107_v19  ;;  %576 = vmatpush3.msra.mxu0 %v124_v20  ;;  %v381_v3 = vld [vmem:[#allocation8 + $0x30] sm:$0xff]  ;;  %v380_v4 = vld [vmem:[#allocation8 + $0x28] sm:$0xff]  ;;  %v379_v5 = vld [vmem:[#allocation8 + $0x20] sm:$0xff] }
  0x46   :  { %614 = vmatprep.subr.mxu1 %v830_v1  ;;  %577 = vmatprep.subr.mxu0 %v830_v1  ;;  %v378_v6 = vld [vmem:[#allocation8 + $0x18] sm:$0xff]  ;;  %v490_v10 = vld [vmem:[%s994_s3] ss:$0 sm:$0xff]  ;;  %v377_v15 = vld [vmem:[#allocation8 + $0x10] sm:$0xff] }
  0x47   :  { %615 = vmatpush3.msra.mxu1 %v106_v21  ;;  %578 = vmatpush3.msra.mxu0 %v123_v22  ;;  %v376_v16 = vld [vmem:[#allocation8 + $0x8] sm:$0xff]  ;;  %v375_v17 = vld [vmem:[#allocation8] sm:$0xff] }
  0x48   :  { %616 = vmatprep.subr.mxu1 %v830_v1  ;;  %579 = vmatprep.subr.mxu0 %v830_v1  ;;  %v491_v18 = vld [vmem:[%s996_s5] ss:$0 sm:$0xff] }
  0x49   :  { %617 = vmatpush3.msra.mxu1 %v105_v23  ;;  %580 = vmatpush3.msra.mxu0 %v122_v24  ;;  %v492_v23 = vld [vmem:[%s998_s7] ss:$0 sm:$0xff] }
  0x4a   :  { %618 = vmatprep.subr.mxu1 %v830_v1  ;;  %581 = vmatprep.subr.mxu0 %v830_v1 }
  0x4b   :  { %619 = vmatpush3.msra.mxu1 %v104_v25  ;;  %582 = vmatpush3.msra.mxu0 %v121_v26 }
  0x4c   :  { %620 = vmatprep.subr.mxu1 %v830_v1  ;;  %583 = vmatprep.subr.mxu0 %v830_v1 }
  0x4d   :  { %621 = vmatpush3.msra.mxu1 %v103_v27  ;;  %584 = vmatpush3.msra.mxu0 %v120_v28 }
  0x4e   :  { %622 = vmatprep.subr.mxu1 %v830_v1  ;;  %585 = vmatprep.subr.mxu0 %v830_v1 }
  0x4f   :  { %623 = vmatpush3.msra.mxu1 %v102_v29  ;;  %586 = vmatpush3.msra.mxu0 %v119_v30 }
  0x50   :  { %624 = vmatprep.subr.mxu1 %v830_v1  ;;  %587 = vmatprep.subr.mxu0 %v830_v1 }
  0x51   :  { %625 = vmatpush3.msra.mxu1 %v101_v31  ;;  %588 = vmatpush3.msra.mxu0 %v118_v32 }
  0x52   :  { %626 = vmatprep.subr.mxu1 %v830_v1  ;;  %589 = vmatprep.subr.mxu0 %v830_v1 }
  0x53   :  { %627 = vmatpush3.msra.mxu1 %v100_v33  ;;  %590 = vmatpush3.msra.mxu0 %v117_v34 }
  0x54   :  { %666 = vmatprep.subr.mxu1 %v830_v1  ;;  %591 = vmatprep.subr.mxu0 %v830_v1 }
  0x55   :  { %592 = vmatpush3.msra.mxu0 %v116_v35 }
  0x56   :  { %631 = vmatprep.subr.mxu0 %v830_v1 }
  0xaf   :  { %v90_v38 = vpop.permute.xlu0 %89 }
  0xb0   :  { %vm91_vm1 = vcmp.eq.s32.totalorder %v87_v37, %v90_v38 }
  0xb1   :  { %629 = vmatmul.mubr.msk.f32.vlgmr.msra.gmra.mxu1 %vm91_vm1, %v833_v39 }
  0xb2   :  { %698 = vmatprep.mubr.msk.f32.mxu1 %vm831_vm0, %v830_v1  ;;  %667 = vmatpush3.msra.mxu1 %v390_v57 }
  0xb3   :  { %668 = vmatprep.subr.mxu1 %v830_v1 }
  0xb4   :  { %v96_v40 = vpop.permute.xlu0 %95  ;;  %669 = vmatpush3.msra.mxu1 %v389_v58 }
  0xb5   :  { %vm97_vm2 = vcmp.eq.s32.totalorder %v87_v37, %v96_v40  ;;  %670 = vmatprep.subr.mxu1 %v830_v1 }
  0xb6   :  { %594 = vmatmul.mubr.msk.f32.vlgmr.msra.gmra.mxu0 %vm97_vm2, %v833_v39  ;;  %671 = vmatpush3.msra.mxu1 %v388_v59 }
  0xb7   :  { %632 = vmatpush3.msra.mxu0 %v296_v41  ;;  %663 = vmatprep.mubr.msk.f32.mxu0 %vm831_vm0, %v830_v1 }
  0xb8   :  { %633 = vmatprep.subr.mxu0 %v830_v1  ;;  %672 = vmatprep.subr.mxu1 %v830_v1 }
  0xb9   :  { %634 = vmatpush3.msra.mxu0 %v295_v42  ;;  %673 = vmatpush3.msra.mxu1 %v387_v60 }
  0xba   :  { %635 = vmatprep.subr.mxu0 %v830_v1  ;;  %674 = vmatprep.subr.mxu1 %v830_v1 }
  0xbb   :  { %636 = vmatpush3.msra.mxu0 %v294_v43  ;;  %675 = vmatpush3.msra.mxu1 %v386_v61 }
  0xbc   :  { %637 = vmatprep.subr.mxu0 %v830_v1  ;;  %676 = vmatprep.subr.mxu1 %v830_v1 }
  0xbd   :  { %638 = vmatpush3.msra.mxu0 %v293_v44  ;;  %677 = vmatpush3.msra.mxu1 %v385_v62 }
  0xbe   :  { %639 = vmatprep.subr.mxu0 %v830_v1  ;;  %678 = vmatprep.subr.mxu1 %v830_v1 }
  0xbf   :  { %640 = vmatpush3.msra.mxu0 %v292_v45  ;;  %679 = vmatpush3.msra.mxu1 %v384_v63 }
  0xc0   :  { %641 = vmatprep.subr.mxu0 %v830_v1  ;;  %680 = vmatprep.subr.mxu1 %v830_v1 }
  0xc1   :  { %642 = vmatpush3.msra.mxu0 %v291_v46  ;;  %681 = vmatpush3.msra.mxu1 %v383_v0 }
  0xc2   :  { %643 = vmatprep.subr.mxu0 %v830_v1  ;;  %682 = vmatprep.subr.mxu1 %v830_v1 }
  0xc3   :  { %644 = vmatpush3.msra.mxu0 %v290_v47  ;;  %683 = vmatpush3.msra.mxu1 %v382_v2 }
  0xc4   :  { %645 = vmatprep.subr.mxu0 %v830_v1  ;;  %684 = vmatprep.subr.mxu1 %v830_v1 }
  0xc5   :  { %646 = vmatpush3.msra.mxu0 %v289_v48  ;;  %685 = vmatpush3.msra.mxu1 %v381_v3 }
  0xc6   :  { %647 = vmatprep.subr.mxu0 %v830_v1  ;;  %686 = vmatprep.subr.mxu1 %v830_v1 }
  0xc7   :  { %648 = vmatpush3.msra.mxu0 %v288_v49  ;;  %687 = vmatpush3.msra.mxu1 %v380_v4 }
  0xc8   :  { %649 = vmatprep.subr.mxu0 %v830_v1  ;;  %688 = vmatprep.subr.mxu1 %v830_v1 }
  0xc9   :  { %650 = vmatpush3.msra.mxu0 %v287_v50  ;;  %689 = vmatpush3.msra.mxu1 %v379_v5 }
  0xca   :  { %651 = vmatprep.subr.mxu0 %v830_v1  ;;  %690 = vmatprep.subr.mxu1 %v830_v1 }
  0xcb   :  { %652 = vmatpush3.msra.mxu0 %v286_v51  ;;  %691 = vmatpush3.msra.mxu1 %v378_v6 }
  0xcc   :  { %653 = vmatprep.subr.mxu0 %v830_v1  ;;  %692 = vmatprep.subr.mxu1 %v830_v1 }
  0xcd   :  { %654 = vmatpush3.msra.mxu0 %v285_v52  ;;  %693 = vmatpush3.msra.mxu1 %v377_v15 }
  0xce   :  { %655 = vmatprep.subr.mxu0 %v830_v1  ;;  %694 = vmatprep.subr.mxu1 %v830_v1 }
  0xcf   :  { %656 = vmatpush3.msra.mxu0 %v284_v53  ;;  %695 = vmatpush3.msra.mxu1 %v376_v16 }
  0xd0   :  { %657 = vmatprep.subr.mxu0 %v830_v1  ;;  %696 = vmatprep.subr.mxu1 %v830_v1 }
  0xd1   :  { %658 = vmatpush3.msra.mxu0 %v283_v54  ;;  %697 = vmatpush3.msra.mxu1 %v375_v17 }
  0xd2   :  { %659 = vmatprep.subr.mxu0 %v830_v1 }
  0xd3   :  { %660 = vmatpush3.msra.mxu0 %v282_v55 }
  0xd4   :  { %661 = vmatprep.subr.mxu0 %v830_v1 }
  0xd5   :  { %662 = vmatpush3.msra.mxu0 %v281_v56 }
 0x171   :  { %v268_v7 = vpop.f32.mrf.mxu1 }
 0x173   :  { %v630_v8 = vpop.f32.mrf.mxu1 }
 0x176   :  { %v198_v9 = vpop.f32.mrf.mxu0 }
 0x177   :  { %v269_v11 = vadd.f32 %v268_v7, %v198_v9 }
 0x178   :  { %v595_v12 = vpop.f32.mrf.mxu0 }
 0x179   :  { %v279_v13 = vadd.f32 %v490_v10, %v269_v11 }
 0x17b   :  { %v280_v14 = vmax.f32 %v279_v13, 0.0 }
 0x17d   :  { %664 = vmatmul.mubr.f32.vlgmr.msra.gmra.mxu0 %v280_v14 }
 0x23d   :  { %v370_v19 = vpop.f32.mrf.mxu0 }
 0x23e   :  { %v371_v20 = vadd.f32 %v491_v18, %v370_v19 }
 0x23f   :  { %v665_v21 = vpop.f32.mrf.mxu0 }
 0x240   :  { %v374_v22 = vmax.f32 %v371_v20, 0.0 }
 0x242   :  { %699 = vmatmul.mubr.f32.vlgmr.msra.gmra.mxu1 %v374_v22 }
 0x302   :  { %v464_v24 = vpop.f32.mrf.mxu1 }
 0x303   :  { %v465_v25 = vadd.f32 %v492_v23, %v464_v24 }
 0x304   :  { %v700_v1 = vpop.f32.mrf.mxu1 }
 0x305   :  { %468 = vst [vmem:[#allocation10] sm:$0xff] %v465_v25 }
 0x306   :  { %806 = shalt.err (!%p803_p10)
}
 0x307   :  { %478 = dma.vmem_to_hbm [thread:$0]  %s476_s30, 128, %s999_s8, [#allocation4]  }
 0x308   :  { %821 = dma.done.wait [#allocation4], 128  }
 0x309   :  { %822 = vsyncadd [#allocation4], 4294967168 }
 0x30a   :  { %482 = vsyncpa [#allocation3], 1 }
 0x30b   :  { %483 = vsyncpa [#allocation6], 1 }
 0x30c   :  { %484 = vsyncpa [#allocation9], 1 }
 0x30d   :  { %485 = vsyncpa [#allocation4], 1 }

</bundles_post_ra>
